<compile_context>
chip_gen: v7x
topology: tpu7x:2x2x1
jax: 0.10.0
libtpu: 0.0.40
codegen_flags: <defaults>
</compile_context>

<pallas_src>
import functools

import jax
import jax.numpy as jnp
from jax import lax
from jax.experimental import pallas as pl
from jax.experimental.pallas import tpu as pltpu


def _round_up(x, m):
    return -(-x // m) * m


def _pad_to(a, shape):
    return jnp.pad(a, tuple((0, t - s) for s, t in zip(a.shape, shape)))


def _choose_images_per_step(batch, howo):
    """Pick images per grid step: whole images, ~1K lanes/step, >=2 steps if possible."""
    best_d, best_key = None, None
    for d in range(1, batch + 1):
        if batch % d:
            continue
        steps = batch // d
        n_valid = d * howo
        n_step = _round_up(n_valid, 128)
        pad_frac = (n_step - n_valid) / n_step
        key = (
            n_step > 2048,          # keep per-step block small (v7x 64 MiB VMEM)
            steps < 2,              # prefer >=2 grid steps (dual-TC sharding on v7x)
            pad_frac,               # prefer less lane padding
            abs(n_step - 1024),     # prefer ~1K lanes/step (HBM roofline sweet spot)
        )
        if best_key is None or key < best_key:
            best_key, best_d = key, d
    return best_d


def _iris_block_kernel(p_ref, m_ref, w1_ref, b1_ref, a1_ref, dww_ref, dwb_ref,
                       w2_ref, b2_ref, a2_ref, out_ref, *, stride, cin, wo):
    # p_ref: (K, N) bf16 patches, K = stride*stride*cin (patch order kh, kw, c),
    #        N = images_in_this_step * Ho * Wo (+ optional lane pad).
    # m_ref: (4, N) f32 {0,1} border masks: h>=1, h<=Ho-2, w>=1, w<=Wo-2.
    p = p_ref[...]
    _, n = p.shape
    coutp = out_ref.shape[0]

    # ---- conv1 (kernel=stride, stride=stride, pad=0): (C2p,K)@(K,N) on MXU ----
    h1 = jnp.dot(w1_ref[...], p, preferred_element_type=jnp.float32)
    h1 = h1 + b1_ref[...]
    h1 = jnp.where(h1 >= 0, h1, a1_ref[...] * h1)            # PReLU(C2)

    # ---- depthwise 3x3, stride 1, pad 1: lane rolls + precomputed masks ----
    m = m_ref[...]
    h_ge1, h_le = m[0:1, :], m[1:2, :]
    w_ge1, w_le = m[2:3, :], m[3:4, :]
    tap_mask = {                                   # hoisted out of the tap loop
        (-1, -1): h_ge1 * w_ge1, (-1, 0): h_ge1, (-1, 1): h_ge1 * w_le,
        (0, -1): w_ge1,                           (0, 1): w_le,
        (1, -1): h_le * w_ge1,   (1, 0): h_le,   (1, 1): h_le * w_le,
    }

    dww = dww_ref[...]                             # (C2p, 9), tap index kh*3+kw
    acc = h1 * dww[:, 4:5]                         # center tap, mask-free
    for kh in range(3):
        for kw in range(3):
            dh, dw = kh - 1, kw - 1
            if dh == 0 and dw == 0:
                continue
            off = dh * wo + dw                     # flat lane offset
            shifted = pltpu.roll(h1, (-off) % n, 1)   # shifted[p] = h1[p+off]
            k = kh * 3 + kw
            acc = acc + (shifted * tap_mask[(dh, dw)]) * dww[:, k:k + 1]
    acc = acc + dwb_ref[...]

    # ---- pointwise 1x1 conv: (Coutp, C2p) @ (C2p, N), bf16 operands ----
    h2 = jnp.dot(w2_ref[...], acc.astype(w2_ref.dtype),
                 preferred_element_type=jnp.float32)
    h2 = h2 + b2_ref[...]

    # ---- skip path (maxpool / identity), channel pad, residual, PReLU ----
    if stride == 2:
        # MaxPool2d(2, 2) == max over the same 2x2 patch taps used by conv1.
        res = p[0:cin, :]
        for t in range(1, stride * stride):
            res = jnp.maximum(res, p[t * cin:(t + 1) * cin, :])
    else:
        res = p                                    # identity (cin == cout)
    res = res.astype(jnp.float32)
    if res.shape[0] < coutp:
        res = jnp.concatenate(
            [res, jnp.zeros((coutp - res.shape[0], n), jnp.float32)], axis=0)

    out = h2 + res
    a2 = a2_ref[...]
    out_ref[...] = jnp.where(out >= 0, out, a2 * out).astype(out_ref.dtype)


def iris_block_forward(x_nchw, params, *, stride):
    """IrisBlock forward.  x_nchw: (B, Cin, H, W) f32 -> (B, Cout, H//s, W//s)."""
    w1, b1, a1, dww, dwb, w2, b2, a2 = params
    B, Cin, H, W = x_nchw.shape
    C2 = w1.shape[0]
    Cout = w2.shape[0]
    Ho, Wo = H // stride, W // stride
    HoWo = Ho * Wo
    K = stride * stride * Cin

    if stride == 1 and Cin != Cout:
        # The PyTorch module cannot add (B,Cout,H,W) + (B,Cin,H,W) either.
        raise ValueError("stride=1 IrisBlock requires in_channels == out_channels")

    C2p = _round_up(C2, 8)        # f32 sublane granule
    Coutp = _round_up(Cout, 8)

    # ---- glue: im2col patches in (K, B*Ho*Wo) bf16, N order (b, ho, wo) ----
    if stride == 1:
        patches = jnp.transpose(x_nchw, (1, 0, 2, 3)).reshape(Cin, B * HoWo)
    else:
        p6 = x_nchw.reshape(B, Cin, Ho, stride, Wo, stride)
        patches = jnp.transpose(p6, (3, 5, 1, 0, 2, 4)).reshape(K, B * HoWo)
    patches = patches.astype(jnp.bfloat16)   # fused with the transpose under jit

    # ---- glue: parameter layouts (channels on sublanes, zero-padded) ----
    w1_k = _pad_to(jnp.transpose(w1, (0, 2, 3, 1)).reshape(C2, K),
                   (C2p, K)).astype(jnp.bfloat16)
    dww_k = _pad_to(dww.reshape(C2, 9), (C2p, 9))
    w2_k = _pad_to(w2.reshape(Cout, C2), (Coutp, C2p)).astype(jnp.bfloat16)
    b1_k = _pad_to(b1.reshape(C2, 1), (C2p, 1))
    a1_k = _pad_to(a1.reshape(C2, 1), (C2p, 1))
    dwb_k = _pad_to(dwb.reshape(C2, 1), (C2p, 1))
    b2_k = _pad_to(b2.reshape(Cout, 1), (Coutp, 1))
    a2_k = _pad_to(a2.reshape(Cout, 1), (Coutp, 1))

    # ---- grid: whole-image blocks, ~1K lanes per step, >=2 steps if possible ----
    imgs_per_step = _choose_images_per_step(B, HoWo)
    grid_steps = B // imgs_per_step
    n_valid_step = imgs_per_step * HoWo
    n_step = _round_up(n_valid_step, 128)
    lane_pad = n_step - n_valid_step
    if lane_pad:
        patches = jnp.pad(patches.reshape(K, grid_steps, n_valid_step),
                          ((0, 0), (0, 0), (0, lane_pad)))
        patches = patches.reshape(K, grid_steps * n_step)

    # ---- border masks precomputed once (no per-lane div/mod in-kernel) ----
    pos = jnp.arange(n_valid_step, dtype=jnp.int32)
    q = pos % HoWo
    h_idx = q // Wo
    w_idx = q % Wo
    masks = jnp.stack([h_idx >= 1, h_idx <= Ho - 2,
                       w_idx >= 1, w_idx <= Wo - 2]).astype(jnp.float32)
    if lane_pad:
        masks = jnp.pad(masks, ((0, 0), (0, lane_pad)))
    # Same mask block applies to every grid step (blocks start at whole-image
    # boundaries), so its BlockSpec index is constant -> fetched once.

    # ---- explicit VMEM budget (v7x: 64 MiB physical / 32 MiB scoped default) ----
    est_bytes = (2 * K * n_step * 2          # double-buffered bf16 patch blocks
                 + 2 * Coutp * n_step * 4    # double-buffered f32 output blocks
                 + 4 * n_step * 4            # resident border masks
                 + 12 * C2p * n_step * 4)    # h1 / acc / roll temporaries headroom
    vmem_limit = int(min(60 * (1 << 20), max(32 * (1 << 20), 3 * est_bytes)))

    kernel = functools.partial(_iris_block_kernel, stride=stride, cin=Cin, wo=Wo)
    _c2 = lambda i: (0, 0)                   # constant index map for resident inputs

    out_flat = pl.pallas_call(
        kernel,
        out_shape=jax.ShapeDtypeStruct((Coutp, grid_steps * n_step), x_nchw.dtype),
        grid_spec=pltpu.PrefetchScalarGridSpec(
            num_scalar_prefetch=0,
            grid=(grid_steps,),
            in_specs=[
                pl.BlockSpec((K, n_step), lambda i: (0, i)),
                pl.BlockSpec((4, n_step), _c2),
                pl.BlockSpec((C2p, K), _c2),
                pl.BlockSpec((C2p, 1), _c2),
                pl.BlockSpec((C2p, 1), _c2),
                pl.BlockSpec((C2p, 9), _c2),
                pl.BlockSpec((C2p, 1), _c2),
                pl.BlockSpec((Coutp, C2p), _c2),
                pl.BlockSpec((Coutp, 1), _c2),
                pl.BlockSpec((Coutp, 1), _c2),
            ],
            out_specs=pl.BlockSpec((Coutp, n_step), lambda i: (0, i)),
        ),
        compiler_params=pltpu.CompilerParams(
            dimension_semantics=("parallel",),
            vmem_limit_bytes=vmem_limit),
    )(patches, masks, w1_k, b1_k, a1_k, dww_k, dwb_k, w2_k, b2_k, a2_k)

    # (Coutp, grid_steps*n_step) -> NCHW (drop channel / lane padding).
    out = out_flat.reshape(Coutp, grid_steps, n_step)[:Cout, :, :n_valid_step]
    out = out.reshape(Cout, B, Ho, Wo)
    return jnp.transpose(out, (1, 0, 2, 3))


def init_params(key, in_channels, out_channels, stride):
    """Deterministic synthetic parameters matching the PyTorch module's shapes."""
    C2 = out_channels // 2
    ks = jax.random.split(key, 8)
    w1 = 0.2 * jax.random.normal(ks[0], (C2, in_channels, stride, stride), jnp.float32)
    b1 = 0.1 * jax.random.normal(ks[1], (C2,), jnp.float32)
    a1 = jax.random.uniform(ks[2], (C2,), jnp.float32, 0.1, 0.4)       # PReLU alpha
    dww = 0.2 * jax.random.normal(ks[3], (C2, 1, 3, 3), jnp.float32)
    dwb = 0.1 * jax.random.normal(ks[4], (C2,), jnp.float32)
    w2 = 0.2 * jax.random.normal(ks[5], (out_channels, C2, 1, 1), jnp.float32)
    b2 = 0.1 * jax.random.normal(ks[6], (out_channels,), jnp.float32)
    a2 = jax.random.uniform(ks[7], (out_channels,), jnp.float32, 0.1, 0.4)
    return (w1, b1, a1, dww, dwb, w2, b2, a2)


def ref_forward(x, params, stride):
    """Pure-JAX f32 reference (mirrors the PyTorch forward, NCHW)."""
    w1, b1, a1, dww, dwb, w2, b2, a2 = params
    Cin = x.shape[1]
    C2 = w1.shape[0]
    Cout = w2.shape[0]
    channel_pad = Cout - Cin
    dn = ('NCHW', 'OIHW', 'NCHW')

    out = lax.conv_general_dilated(x, w1, (stride, stride), 'VALID',
                                   dimension_numbers=dn)
    out = out + b1[None, :, None, None]
    out = jnp.where(out >= 0, out, a1[None, :, None, None] * out)
    out = lax.conv_general_dilated(out, dww, (1, 1), ((1, 1), (1, 1)),
                                   dimension_numbers=dn, feature_group_count=C2)
    out = out + dwb[None, :, None, None]
    out = lax.conv_general_dilated(out, w2, (1, 1), 'VALID',
                                   dimension_numbers=dn)
    out = out + b2[None, :, None, None]
    if stride == 2:
        x = lax.reduce_window(x, -jnp.inf, lax.max, (1, 1, 2, 2), (1, 1, 2, 2),
                              'VALID')
        if channel_pad > 0:
            x = jnp.pad(x, ((0, 0), (0, channel_pad), (0, 0), (0, 0)))
    out = out + x
    return jnp.where(out >= 0, out, a2[None, :, None, None] * out)


if __name__ == "__main__":
    key = jax.random.PRNGKey(0)
    k1, k2, k3, k4 = jax.random.split(key, 4)

    # bf16 matmul operands -> compare against the f32 reference with bf16-level
    # tolerances (structural errors would be O(1), so this is still a real check).
    TOL = dict(atol=5e-2, rtol=5e-2)

    # --- stride=2 block: downsampling + channel padding on the skip path ---
    x2 = jax.random.normal(k1, (2, 4, 16, 16), jnp.float32)
    params2 = init_params(k2, in_channels=4, out_channels=8, stride=2)
    fwd2 = jax.jit(functools.partial(iris_block_forward, stride=2))
    out2 = fwd2(x2, params2)
    jax.block_until_ready(out2)
    ref2 = ref_forward(x2, params2, 2)
    assert out2.shape == (2, 8, 8, 8)
    assert jnp.allclose(out2, ref2, **TOL), float(jnp.max(jnp.abs(out2 - ref2)))

    # --- stride=1 block: identity skip (exercises the multi-step parallel grid) ---
    x1 = jax.random.normal(k3, (2, 8, 16, 16), jnp.float32)
    params1 = init_params(k4, in_channels=8, out_channels=8, stride=1)
    fwd1 = jax.jit(functools.partial(iris_block_forward, stride=1))
    out1 = fwd1(x1, params1)
    jax.block_until_ready(out1)
    ref1 = ref_forward(x1, params1, 1)
    assert out1.shape == (2, 8, 16, 16)
    assert jnp.allclose(out1, ref1, **TOL), float(jnp.max(jnp.abs(out1 - ref1)))

    # TODO(synk): within-image Ho-row tiling with a 1-row halo for very large
    # single images (HoWo >> 2048); current whole-image blocks are correct but
    # can exceed the ~2K-lane per-step target in that regime.
    print("KERNEL_OK")
</pallas_src>

<mosaic_0001>
module attributes {stable_mosaic.version = 11 : i64} {
  func.func @_iris_block_kernel(%arg0: i32, %arg1: memref<16x128xbf16, #tpu.memory_space<vmem>>, %arg2: memref<4x128xf32, #tpu.memory_space<vmem>>, %arg3: memref<8x16xbf16, #tpu.memory_space<vmem>>, %arg4: memref<8x1xf32, #tpu.memory_space<vmem>>, %arg5: memref<8x1xf32, #tpu.memory_space<vmem>>, %arg6: memref<8x9xf32, #tpu.memory_space<vmem>>, %arg7: memref<8x1xf32, #tpu.memory_space<vmem>>, %arg8: memref<8x8xbf16, #tpu.memory_space<vmem>>, %arg9: memref<8x1xf32, #tpu.memory_space<vmem>>, %arg10: memref<8x1xf32, #tpu.memory_space<vmem>>, %arg11: memref<8x128xf32, #tpu.memory_space<vmem>>) attributes {dimension_semantics = [#tpu.dimension_semantics<parallel>], iteration_bounds = array<i64: 2>, scalar_prefetch = 0 : i64, scratch_operands = 0 : i64, tpu.core_type = #tpu.core_type<tc>, window_params = [{transform_indices = @transform_0, window_bounds = array<i64: 16, 128>}, {pipeline_mode = #tpu.pipeline_mode<synchronous>, transform_indices = @transform_1, window_bounds = array<i64: 4, 128>}, {pipeline_mode = #tpu.pipeline_mode<synchronous>, transform_indices = @transform_2, window_bounds = array<i64: 8, 16>}, {pipeline_mode = #tpu.pipeline_mode<synchronous>, transform_indices = @transform_3, window_bounds = array<i64: 8, 1>}, {pipeline_mode = #tpu.pipeline_mode<synchronous>, transform_indices = @transform_4, window_bounds = array<i64: 8, 1>}, {pipeline_mode = #tpu.pipeline_mode<synchronous>, transform_indices = @transform_5, window_bounds = array<i64: 8, 9>}, {pipeline_mode = #tpu.pipeline_mode<synchronous>, transform_indices = @transform_6, window_bounds = array<i64: 8, 1>}, {pipeline_mode = #tpu.pipeline_mode<synchronous>, transform_indices = @transform_7, window_bounds = array<i64: 8, 8>}, {pipeline_mode = #tpu.pipeline_mode<synchronous>, transform_indices = @transform_8, window_bounds = array<i64: 8, 1>}, {pipeline_mode = #tpu.pipeline_mode<synchronous>, transform_indices = @transform_9, window_bounds = array<i64: 8, 1>}, {transform_indices = @transform_10, window_bounds = array<i64: 8, 128>}]} {
    %c0 = arith.constant 0 : index
    %c0_0 = arith.constant 0 : index
    %0 = vector.load %arg1[%c0, %c0_0] : memref<16x128xbf16, #tpu.memory_space<vmem>>, vector<16x128xbf16>
    %c0_1 = arith.constant 0 : index
    %c0_2 = arith.constant 0 : index
    %1 = vector.load %arg3[%c0_1, %c0_2] : memref<8x16xbf16, #tpu.memory_space<vmem>>, vector<8x16xbf16>
    %cst = arith.constant dense<0.000000e+00> : vector<8x128xf32>
    %2 = tpu.matmul %1, %0, %cst {dimension_numbers = #tpu.dot_dimension_numbers<[1], [0], [0], [1], [0, 0, 1, 1], [], []>} : vector<8x16xbf16>, vector<16x128xbf16>, vector<8x128xf32> -> vector<8x128xf32>
    %c0_3 = arith.constant 0 : index
    %c0_4 = arith.constant 0 : index
    %3 = vector.load %arg4[%c0_3, %c0_4] : memref<8x1xf32, #tpu.memory_space<vmem>>, vector<8x1xf32>
    %4 = vector.broadcast %3 : vector<8x1xf32> to vector<8x128xf32>
    %5 = arith.addf %2, %4 : vector<8x128xf32>
    %cst_5 = arith.constant 0.000000e+00 : f32
    %6 = vector.broadcast %cst_5 : f32 to vector<8x128xf32>
    %7 = arith.cmpf oge, %5, %6 : vector<8x128xf32>
    %c0_6 = arith.constant 0 : index
    %c0_7 = arith.constant 0 : index
    %8 = vector.load %arg5[%c0_6, %c0_7] : memref<8x1xf32, #tpu.memory_space<vmem>>, vector<8x1xf32>
    %9 = vector.broadcast %8 : vector<8x1xf32> to vector<8x128xf32>
    %10 = arith.mulf %9, %5 : vector<8x128xf32>
    %11 = arith.select %7, %5, %10 : vector<8x128xi1>, vector<8x128xf32>
    %c0_8 = arith.constant 0 : index
    %c0_9 = arith.constant 0 : index
    %12 = vector.load %arg2[%c0_8, %c0_9] : memref<4x128xf32, #tpu.memory_space<vmem>>, vector<4x128xf32>
    %13 = vector.extract_strided_slice %12 {offsets = [0, 0], sizes = [1, 128], strides = [1, 1]} : vector<4x128xf32> to vector<1x128xf32>
    %14 = vector.extract_strided_slice %12 {offsets = [1, 0], sizes = [1, 128], strides = [1, 1]} : vector<4x128xf32> to vector<1x128xf32>
    %15 = vector.extract_strided_slice %12 {offsets = [2, 0], sizes = [1, 128], strides = [1, 1]} : vector<4x128xf32> to vector<1x128xf32>
    %16 = vector.extract_strided_slice %12 {offsets = [3, 0], sizes = [1, 128], strides = [1, 1]} : vector<4x128xf32> to vector<1x128xf32>
    %17 = arith.mulf %13, %15 : vector<1x128xf32>
    %18 = arith.mulf %13, %16 : vector<1x128xf32>
    %19 = arith.mulf %14, %15 : vector<1x128xf32>
    %20 = arith.mulf %14, %16 : vector<1x128xf32>
    %c0_10 = arith.constant 0 : index
    %c0_11 = arith.constant 0 : index
    %21 = vector.load %arg6[%c0_10, %c0_11] : memref<8x9xf32, #tpu.memory_space<vmem>>, vector<8x9xf32>
    %22 = vector.extract_strided_slice %21 {offsets = [0, 4], sizes = [8, 1], strides = [1, 1]} : vector<8x9xf32> to vector<8x1xf32>
    %23 = vector.broadcast %22 : vector<8x1xf32> to vector<8x128xf32>
    %24 = arith.mulf %11, %23 : vector<8x128xf32>
    %c9_i32 = arith.constant 9 : i32
    %25 = tpu.dynamic_rotate %11 by %c9_i32 dim 1 : vector<8x128xf32>, i32 -> vector<8x128xf32>
    %26 = vector.broadcast %17 : vector<1x128xf32> to vector<8x128xf32>
    %27 = arith.mulf %25, %26 : vector<8x128xf32>
    %28 = vector.extract_strided_slice %21 {offsets = [0, 0], sizes = [8, 1], strides = [1, 1]} : vector<8x9xf32> to vector<8x1xf32>
    %29 = vector.broadcast %28 : vector<8x1xf32> to vector<8x128xf32>
    %30 = arith.mulf %27, %29 : vector<8x128xf32>
    %31 = arith.addf %24, %30 : vector<8x128xf32>
    %c8_i32 = arith.constant 8 : i32
    %32 = tpu.dynamic_rotate %11 by %c8_i32 dim 1 : vector<8x128xf32>, i32 -> vector<8x128xf32>
    %33 = vector.broadcast %13 : vector<1x128xf32> to vector<8x128xf32>
    %34 = arith.mulf %32, %33 : vector<8x128xf32>
    %35 = vector.extract_strided_slice %21 {offsets = [0, 1], sizes = [8, 1], strides = [1, 1]} : vector<8x9xf32> to vector<8x1xf32>
    %36 = vector.broadcast %35 : vector<8x1xf32> to vector<8x128xf32>
    %37 = arith.mulf %34, %36 : vector<8x128xf32>
    %38 = arith.addf %31, %37 : vector<8x128xf32>
    %c7_i32 = arith.constant 7 : i32
    %39 = tpu.dynamic_rotate %11 by %c7_i32 dim 1 : vector<8x128xf32>, i32 -> vector<8x128xf32>
    %40 = vector.broadcast %18 : vector<1x128xf32> to vector<8x128xf32>
    %41 = arith.mulf %39, %40 : vector<8x128xf32>
    %42 = vector.extract_strided_slice %21 {offsets = [0, 2], sizes = [8, 1], strides = [1, 1]} : vector<8x9xf32> to vector<8x1xf32>
    %43 = vector.broadcast %42 : vector<8x1xf32> to vector<8x128xf32>
    %44 = arith.mulf %41, %43 : vector<8x128xf32>
    %45 = arith.addf %38, %44 : vector<8x128xf32>
    %c1_i32 = arith.constant 1 : i32
    %46 = tpu.dynamic_rotate %11 by %c1_i32 dim 1 : vector<8x128xf32>, i32 -> vector<8x128xf32>
    %47 = vector.broadcast %15 : vector<1x128xf32> to vector<8x128xf32>
    %48 = arith.mulf %46, %47 : vector<8x128xf32>
    %49 = vector.extract_strided_slice %21 {offsets = [0, 3], sizes = [8, 1], strides = [1, 1]} : vector<8x9xf32> to vector<8x1xf32>
    %50 = vector.broadcast %49 : vector<8x1xf32> to vector<8x128xf32>
    %51 = arith.mulf %48, %50 : vector<8x128xf32>
    %52 = arith.addf %45, %51 : vector<8x128xf32>
    %c127_i32 = arith.constant 127 : i32
    %53 = tpu.dynamic_rotate %11 by %c127_i32 dim 1 : vector<8x128xf32>, i32 -> vector<8x128xf32>
    %54 = vector.broadcast %16 : vector<1x128xf32> to vector<8x128xf32>
    %55 = arith.mulf %53, %54 : vector<8x128xf32>
    %56 = vector.extract_strided_slice %21 {offsets = [0, 5], sizes = [8, 1], strides = [1, 1]} : vector<8x9xf32> to vector<8x1xf32>
    %57 = vector.broadcast %56 : vector<8x1xf32> to vector<8x128xf32>
    %58 = arith.mulf %55, %57 : vector<8x128xf32>
    %59 = arith.addf %52, %58 : vector<8x128xf32>
    %c121_i32 = arith.constant 121 : i32
    %60 = tpu.dynamic_rotate %11 by %c121_i32 dim 1 : vector<8x128xf32>, i32 -> vector<8x128xf32>
    %61 = vector.broadcast %19 : vector<1x128xf32> to vector<8x128xf32>
    %62 = arith.mulf %60, %61 : vector<8x128xf32>
    %63 = vector.extract_strided_slice %21 {offsets = [0, 6], sizes = [8, 1], strides = [1, 1]} : vector<8x9xf32> to vector<8x1xf32>
    %64 = vector.broadcast %63 : vector<8x1xf32> to vector<8x128xf32>
    %65 = arith.mulf %62, %64 : vector<8x128xf32>
    %66 = arith.addf %59, %65 : vector<8x128xf32>
    %c120_i32 = arith.constant 120 : i32
    %67 = tpu.dynamic_rotate %11 by %c120_i32 dim 1 : vector<8x128xf32>, i32 -> vector<8x128xf32>
    %68 = vector.broadcast %14 : vector<1x128xf32> to vector<8x128xf32>
    %69 = arith.mulf %67, %68 : vector<8x128xf32>
    %70 = vector.extract_strided_slice %21 {offsets = [0, 7], sizes = [8, 1], strides = [1, 1]} : vector<8x9xf32> to vector<8x1xf32>
    %71 = vector.broadcast %70 : vector<8x1xf32> to vector<8x128xf32>
    %72 = arith.mulf %69, %71 : vector<8x128xf32>
    %73 = arith.addf %66, %72 : vector<8x128xf32>
    %c119_i32 = arith.constant 119 : i32
    %74 = tpu.dynamic_rotate %11 by %c119_i32 dim 1 : vector<8x128xf32>, i32 -> vector<8x128xf32>
    %75 = vector.broadcast %20 : vector<1x128xf32> to vector<8x128xf32>
    %76 = arith.mulf %74, %75 : vector<8x128xf32>
    %77 = vector.extract_strided_slice %21 {offsets = [0, 8], sizes = [8, 1], strides = [1, 1]} : vector<8x9xf32> to vector<8x1xf32>
    %78 = vector.broadcast %77 : vector<8x1xf32> to vector<8x128xf32>
    %79 = arith.mulf %76, %78 : vector<8x128xf32>
    %80 = arith.addf %73, %79 : vector<8x128xf32>
    %c0_12 = arith.constant 0 : index
    %c0_13 = arith.constant 0 : index
    %81 = vector.load %arg7[%c0_12, %c0_13] : memref<8x1xf32, #tpu.memory_space<vmem>>, vector<8x1xf32>
    %82 = vector.broadcast %81 : vector<8x1xf32> to vector<8x128xf32>
    %83 = arith.addf %80, %82 : vector<8x128xf32>
    %c0_14 = arith.constant 0 : index
    %c0_15 = arith.constant 0 : index
    %84 = vector.load %arg8[%c0_14, %c0_15] : memref<8x8xbf16, #tpu.memory_space<vmem>>, vector<8x8xbf16>
    %85 = arith.truncf %83 : vector<8x128xf32> to vector<8x128xbf16>
    %cst_16 = arith.constant dense<0.000000e+00> : vector<8x128xf32>
    %86 = tpu.matmul %84, %85, %cst_16 {dimension_numbers = #tpu.dot_dimension_numbers<[1], [0], [0], [1], [0, 0, 1, 1], [], []>} : vector<8x8xbf16>, vector<8x128xbf16>, vector<8x128xf32> -> vector<8x128xf32>
    %c0_17 = arith.constant 0 : index
    %c0_18 = arith.constant 0 : index
    %87 = vector.load %arg9[%c0_17, %c0_18] : memref<8x1xf32, #tpu.memory_space<vmem>>, vector<8x1xf32>
    %88 = vector.broadcast %87 : vector<8x1xf32> to vector<8x128xf32>
    %89 = arith.addf %86, %88 : vector<8x128xf32>
    %90 = vector.extract_strided_slice %0 {offsets = [0, 0], sizes = [4, 128], strides = [1, 1]} : vector<16x128xbf16> to vector<4x128xbf16>
    %91 = vector.extract_strided_slice %0 {offsets = [4, 0], sizes = [4, 128], strides = [1, 1]} : vector<16x128xbf16> to vector<4x128xbf16>
    %92 = arith.maximumf %90, %91 : vector<4x128xbf16>
    %93 = vector.extract_strided_slice %0 {offsets = [8, 0], sizes = [4, 128], strides = [1, 1]} : vector<16x128xbf16> to vector<4x128xbf16>
    %94 = arith.maximumf %92, %93 : vector<4x128xbf16>
    %95 = vector.extract_strided_slice %0 {offsets = [12, 0], sizes = [4, 128], strides = [1, 1]} : vector<16x128xbf16> to vector<4x128xbf16>
    %96 = arith.maximumf %94, %95 : vector<4x128xbf16>
    %97 = arith.extf %96 : vector<4x128xbf16> to vector<4x128xf32>
    %cst_19 = arith.constant 0.000000e+00 : f32
    %98 = vector.broadcast %cst_19 : f32 to vector<4x128xf32>
    %99 = tpu.concatenate %97, %98 in 0 : vector<4x128xf32>, vector<4x128xf32> -> vector<8x128xf32>
    %100 = arith.addf %89, %99 : vector<8x128xf32>
    %c0_20 = arith.constant 0 : index
    %c0_21 = arith.constant 0 : index
    %101 = vector.load %arg10[%c0_20, %c0_21] : memref<8x1xf32, #tpu.memory_space<vmem>>, vector<8x1xf32>
    %cst_22 = arith.constant 0.000000e+00 : f32
    %102 = vector.broadcast %cst_22 : f32 to vector<8x128xf32>
    %103 = arith.cmpf oge, %100, %102 : vector<8x128xf32>
    %104 = vector.broadcast %101 : vector<8x1xf32> to vector<8x128xf32>
    %105 = arith.mulf %104, %100 : vector<8x128xf32>
    %106 = arith.select %103, %100, %105 : vector<8x128xi1>, vector<8x128xf32>
    %c0_23 = arith.constant 0 : index
    %c0_24 = arith.constant 0 : index
    %107 = vector.load %arg11[%c0_23, %c0_24] : memref<8x128xf32, #tpu.memory_space<vmem>>, vector<8x128xf32>
    tpu.vector_store %arg11[%c0_23, %c0_24], %106 {strides = array<i32>} : memref<8x128xf32, #tpu.memory_space<vmem>>, vector<8x128xf32>,
    return
  }
  func.func @transform_0(%arg0: i32) -> (i32, i32) {
    %c0_i32 = arith.constant 0 : i32
    %c0_i32_0 = arith.constant 0 : i32
    return %c0_i32, %arg0 : i32, i32
  }
  func.func @transform_1(%arg0: i32) -> (i32, i32) {
    %c0_i32 = arith.constant 0 : i32
    %c0_i32_0 = arith.constant 0 : i32
    %c0_i32_1 = arith.constant 0 : i32
    return %c0_i32, %c0_i32_0 : i32, i32
  }
  func.func @transform_2(%arg0: i32) -> (i32, i32) {
    %c0_i32 = arith.constant 0 : i32
    %c0_i32_0 = arith.constant 0 : i32
    %c0_i32_1 = arith.constant 0 : i32
    return %c0_i32, %c0_i32_0 : i32, i32
  }
  func.func @transform_3(%arg0: i32) -> (i32, i32) {
    %c0_i32 = arith.constant 0 : i32
    %c0_i32_0 = arith.constant 0 : i32
    %c0_i32_1 = arith.constant 0 : i32
    return %c0_i32, %c0_i32_0 : i32, i32
  }
  func.func @transform_4(%arg0: i32) -> (i32, i32) {
    %c0_i32 = arith.constant 0 : i32
    %c0_i32_0 = arith.constant 0 : i32
    %c0_i32_1 = arith.constant 0 : i32
    return %c0_i32, %c0_i32_0 : i32, i32
  }
  func.func @transform_5(%arg0: i32) -> (i32, i32) {
    %c0_i32 = arith.constant 0 : i32
    %c0_i32_0 = arith.constant 0 : i32
    %c0_i32_1 = arith.constant 0 : i32
    return %c0_i32, %c0_i32_0 : i32, i32
  }
  func.func @transform_6(%arg0: i32) -> (i32, i32) {
    %c0_i32 = arith.constant 0 : i32
    %c0_i32_0 = arith.constant 0 : i32
    %c0_i32_1 = arith.constant 0 : i32
    return %c0_i32, %c0_i32_0 : i32, i32
  }
  func.func @transform_7(%arg0: i32) -> (i32, i32) {
    %c0_i32 = arith.constant 0 : i32
    %c0_i32_0 = arith.constant 0 : i32
    %c0_i32_1 = arith.constant 0 : i32
    return %c0_i32, %c0_i32_0 : i32, i32
  }
  func.func @transform_8(%arg0: i32) -> (i32, i32) {
    %c0_i32 = arith.constant 0 : i32
    %c0_i32_0 = arith.constant 0 : i32
    %c0_i32_1 = arith.constant 0 : i32
    return %c0_i32, %c0_i32_0 : i32, i32
  }
  func.func @transform_9(%arg0: i32) -> (i32, i32) {
    %c0_i32 = arith.constant 0 : i32
    %c0_i32_0 = arith.constant 0 : i32
    %c0_i32_1 = arith.constant 0 : i32
    return %c0_i32, %c0_i32_0 : i32, i32
  }
  func.func @transform_10(%arg0: i32) -> (i32, i32) {
    %c0_i32 = arith.constant 0 : i32
    %c0_i32_0 = arith.constant 0 : i32
    return %c0_i32, %arg0 : i32, i32
  }
}

</mosaic_0001>

<bundles_post_ra>
// kernel: iris_block_forward.1
= control target key start
LH: loop header
LB: loop body
LE: loop exit
PB: predicated region body
PF: predicated region fallthrough
CT: control target
= control target key end

     0   :  { %s924_s13 = smov 0   ;;  %s926_s14 = smov 0   ;;  %s1033_s0 = inlined_call_operand.vmem [shape: bf16[16,256], index: 0, kind: input, shape index: {}]   ;;  %s1034_s1 = inlined_call_operand.vmem [shape: f32[4,128], index: 1, kind: input, shape index: {}]   ;;  %s1035_s2 = inlined_call_operand.vmem [shape: bf16[8,16], index: 2, kind: input, shape index: {}]   ;;  %s1036_s3 = inlined_call_operand.vmem [shape: f32[8,1], index: 3, kind: input, shape index: {}]   ;;  %s1037_s4 = inlined_call_operand.vmem [shape: f32[8,1], index: 4, kind: input, shape index: {}]   ;;  %s1038_s5 = inlined_call_operand.vmem [shape: f32[8,9], index: 5, kind: input, shape index: {}]   ;;  %s1039_s6 = inlined_call_operand.vmem [shape: f32[8,1], index: 6, kind: input, shape index: {}]   ;;  %s1040_s7 = inlined_call_operand.vmem [shape: bf16[8,8], index: 7, kind: input, shape index: {}]   ;;  %s1041_s8 = inlined_call_operand.vmem [shape: f32[8,1], index: 8, kind: input, shape index: {}]   ;;  %s1042_s9 = inlined_call_operand.vmem [shape: f32[8,1], index: 9, kind: input, shape index: {}]   ;;  %s1043_s10 = inlined_call_operand.vmem [shape: f32[8,256], index: 10, kind: output, shape index: {}]  }
   0x1   :  { %s928_s15 = smov 0  }
   0x2 LB: > { %s738_s16 = sadd.s32 4294967295, %s848_s15   ;;  %s941_s17 = sadd.s32 1, %s848_s15   ;;  %s848_s15 = sphi %s928_s15, %s1046_s15   ;;  %s844_s14 = sphi %s926_s14, %s1045_s14   ;;  %s840_s13 = sphi %s924_s13, %s1044_s13  }
   0x3   : > { %s24_s18 = ssub.s32 %s848_s15, %s941_s17  ;;  %s27_s19 = sadd.s32 1, %s844_s14 }
   0x4   : > { %p25_p0 = scmp.eq.s32.totalorder %s24_s18, 0  ;;  %p34_p1 = scmp.ne.s32.totalorder %s844_s14, %s840_s13 }
   0x5   : > { %p35_p2 = scmp.eq.s32.totalorder %s848_s15, 0  ;;  %p741_p4 = scmp.ge.s32.totalorder %s848_s15, 2 }
   0x6   : > { %s950_s20 = scalar_select %p25_p0, %s844_s14, %s27_s19  }
   0x7   : > { %p36_p3 = por %p35_p2, %p34_p1  ;;  %302 = sbr.rel (%p741_p4) target bundleno = 21 (0x15), region = 52 }
   0xe   : > { %305 = sbr.rel (!%p36_p3) target bundleno = 21 (0x15), region = 56  ;;  %s307_s21 = sand.u32 (%p36_p3), 1, %s844_s14  }
   0xf   : > { %s743_s22 = sshll.u32 (%p36_p3), %s848_s15, 2  ;;  %s742_s23 = sshll.u32 (%p36_p3), %s307_s21, 3 }
  0x10   : > { %s311_s26 = scalar_lea.vmem (%p36_p3), %s1033_s0, %s743_s22  ;;  %s309_s27 = scalar_lea.vmem (%p36_p3), [#allocation2], %s742_s23 }
  0x11   : > { %v327_v0 = vld [vmem:[%s311_s26] sm:$0xf] (%p36_p3)  ;;  %v329_v1 = vld [vmem:[%s311_s26 + $0x8] sm:$0xf] (%p36_p3) }
  0x12   : > { %328 = vst [vmem:[%s309_s27] sm:$0xf] (%p36_p3), %v327_v0  ;;  %330 = vst [vmem:[%s309_s27 + $0x4] sm:$0xf] (%p36_p3), %v329_v1 }
  0x15 PF: > { %p744_p5 = scmp.ge.s32.totalorder %s848_s15, 1  ;;  %p356_p6 = scmp.lt.s32.totalorder %s848_s15, 3 }
  0x17   : > { %p357_p7 = pnand %p744_p5, %p356_p6 }
  0x18   : > { %s363_s28 = sand.u32 (!%p357_p7), 1, %s840_s13   ;;  %v850_v2 = vmov (!%p357_p7), 0.0   ;;  %vm851_vm0 = vmmov (!%p357_p7), 0   ;;  %v407_v3 = vld [vmem:[%s1036_s3] sm:$0xff] (!%p357_p7)  ;;  %v852_v5 = vmov (!%p357_p7), 0   ;;  %v853_v6 = vmov (!%p357_p7), 4  }
  0x19   : > { %360 = sbr.rel (%p357_p7) target bundleno = 628 (0x274), region = 97  ;;  %758 = vmatprep.subr.bf16.mxu0 (!%p357_p7), %v850_v2  ;;  %s745_s29 = sshll.u32 (!%p357_p7), %s363_s28, 3  ;;  %760 = vmatprep.mubr.msk.bf16.mxu0 (!%p357_p7), %vm851_vm0, %v850_v2  ;;  %v968_v4 = vld [vmem:[%s1038_s5] sm:$0xff] (!%p357_p7)  ;;  %vm419_vm1 = vcmask (!%p357_p7), 130048   ;;  %v854_v15 = vmov (!%p357_p7), 1   ;;  %v855_v16 = vmov (!%p357_p7), 2   ;;  %v492_v41 = vlaneseq (!%p357_p7) }
  0x1a   : > { %813 = vset.pattern.permute.xlu0 (!%p357_p7), %v852_v5  ;;  %814 = vset.pattern.permute.xlu1 (!%p357_p7), %v853_v6  ;;  %s365_s13 = scalar_lea.vmem (!%p357_p7), [#allocation2], %s745_s29  ;;  %v464_v11 = vld [vmem:[%s1037_s4] sm:$0xff] (!%p357_p7)  ;;  %v856_v17 = vmov (!%p357_p7), 3   ;;  %v857_v18 = vmov (!%p357_p7), 5   ;;  %v858_v19 = vmov (!%p357_p7), 6   ;;  %v859_v20 = vmov (!%p357_p7), 7  }
  0x1b   : > { %v404_v7 = vld [vmem:[%s365_s13] sm:$0xf] (!%p357_p7)  ;;  %v971_v8 = vld [vmem:[%s365_s13 + $0x4] sm:$0xf] (!%p357_p7)  ;;  %410 = vperm.xlu0 (!%p357_p7), %813, %v407_v3   ;;  %486 = vperm.xlu1 (!%p357_p7), %814, %v968_v4   ;;  %v860_v21 = vmov (!%p357_p7), 8   ;;  %s861_s24 = smov (!%p357_p7), 7  }
  0x1c   : > { %v747_v9 = vcombine.low (!%p357_p7), %v404_v7, %v971_v8  ;;  %v750_v10 = vrot.slane (!%p357_p7), %v404_v7, 10  ;;  %764 = vmatprep.subr.bf16.mxu1 (!%p357_p7), %v850_v2  ;;  %766 = vmatprep.mubr.msk.bf16.mxu1 (!%p357_p7), %vm851_vm0, %v850_v2  ;;  %v406_v13 = vld [vmem:[%s1035_s2] sm:$0xf] (!%p357_p7)  ;;  %s862_s25 = smov (!%p357_p7), 9   ;;  %s863_s26 = smov (!%p357_p7), 1   ;;  %v751_v33 = vrot.slane (!%p357_p7), %v971_v8, 10 }
  0x1d   : > { %s864_s27 = smov (!%p357_p7), 8   ;;  %s865_s28 = smov (!%p357_p7), 127   ;;  %v594_v31 = vld [vmem:[%s1039_s6] sm:$0xff] (!%p357_p7)  ;;  %v493_v44 = vshrl.u32 (!%p357_p7), %v492_v41, 7  ;;  %vm613_vm3 = vcmask (!%p357_p7), 1043456   ;;  %vm609_vm4 = vcmask (!%p357_p7), 64512  }
  0x1e   : > { %759 = vmatpush3.bf16.msra.mxu0 (!%p357_p7), %v747_v9  ;;  %v979_v12 = vmax.bf16 (!%p357_p7), %v750_v10, %v404_v7  ;;  %s866_s29 = smov (!%p357_p7), 121   ;;  %s867_s30 = smov (!%p357_p7), 120   ;;  %v669_v32 = vld [vmem:[%s1042_s9] sm:$0xff] (!%p357_p7) }
  0x1f   : > { %467 = vperm.xlu0 (!%p357_p7), %813, %v464_v11   ;;  %815 = vset.pattern.permute.xlu1 (!%p357_p7), %v852_v5  ;;  %s868_s18 = smov (!%p357_p7), 119   ;;  %v603_v35 = vld [vmem:[%s1041_s8] sm:$0xff] (!%p357_p7)  ;;  %v494_v48 = vsub.s32 (!%p357_p7), 0, %v493_v44  ;;  %v533_v62 = vsub.s32 (!%p357_p7), 2, %v493_v44  ;;  %v559_v9 = vsub.s32 (!%p357_p7), 1, %v493_v44  ;;  %p399_p8 = scmp.lt.s32.totalorder (!%p357_p7), %s738_s16, 1 }
  0x20   : > { %v661_v14 = vmax.bf16 %v979_v12, %v971_v8  ;;  %498 = vperm.xlu1 %815, %v968_v4   ;;  %v472_v43 = vld [vmem:[%s1034_s1] sm:$0xf] }
  0x21   : > { %761 = vmatmul.mubr.msk.bf16.vlgmr.msra.gmra.mrb[0].mxu0 %vm419_vm1, %v406_v13  ;;  %v474_v45 = vrot.slane %v472_v43, 2  ;;  %v477_v50 = vrot.slane %v472_v43, 3  ;;  %v508_v54 = vrot.slane %v472_v43, %v494_v48  ;;  %v480_v1 = vrot.slane %v472_v43, 1  ;;  %s1048_s16 = smov (!%p399_p8, %s738_s16), 1 }
  0x22   : > { %v1004_v34 = vmax.bf16 %v751_v33, %v661_v14 }
  0x23   : > { %816 = vset.pattern.permute.xlu0 %v854_v15  ;;  %v476_v49 = vmul.f32 %v474_v45, %v472_v43  ;;  %v479_v55 = vmul.f32 %v477_v50, %v472_v43  ;;  %v482_v8 = vmul.f32 %v480_v1, %v472_v43 }
  0x24   : > { %817 = vset.pattern.permute.xlu1 %v855_v16  ;;  %511 = vperm.xlu0 %816, %v968_v4  }
  0x25   : > { %524 = vperm.xlu1 %817, %v968_v4   ;;  %v495_v51 = vrot.slane %v476_v49, %v494_v48  ;;  %v521_v60 = vrot.slane %v479_v55, %v494_v48  ;;  %v560_v14 = vrot.slane %v482_v8, %v559_v9 }
  0x28   : > { %818 = vset.pattern.permute.xlu0 %v856_v17 }
  0x29   : > { %819 = vset.pattern.permute.xlu1 %v857_v18  ;;  %537 = vperm.xlu0 %818, %v968_v4  }
  0x2a   : > { %550 = vperm.xlu1 %819, %v968_v4  }
  0x2d   : > { %823 = vset.pattern.permute.xlu0 %v852_v5 }
  0x2e   : > { %820 = vset.pattern.permute.xlu1 %v858_v19 }
  0x2f   : > { %563 = vperm.xlu1 %820, %v968_v4  }
  0x33   : > { %821 = vset.pattern.permute.xlu1 %v859_v20 }
  0x34   : > { %576 = vperm.xlu1 %821, %v968_v4  }
  0x38   : > { %822 = vset.pattern.permute.xlu1 %v860_v21  ;;  %v573_v21 = vrot.slane %v472_v43, %v559_v9 }
  0x9a   : > { %v411_v22 = vpop.permute.xlu0 %410  ;;  %v487_v36 = vpop.permute.xlu1 %486 }
  0x9e   : > { %v468_v26 = vpop.permute.xlu0 %467 }
  0x9f   : > { %v499_v37 = vpop.permute.xlu1 %498 }
  0xa3   : > { %v512_v42 = vpop.permute.xlu0 %511 }
  0xa4   : > { %v525_v38 = vpop.permute.xlu1 %524 }
  0xa8   : > { %v538_v47 = vpop.permute.xlu0 %537 }
  0xa9   : > { %v551_v39 = vpop.permute.xlu1 %550 }
  0xae   : > { %v564_v40 = vpop.permute.xlu1 %563 }
  0xb3   : > { %v577_v46 = vpop.permute.xlu1 %576 }
  0xf4   : > { %v457_v23 = vpop.f32.mrb[0].mxu0 }
  0xf5   : > { %v458_v24 = vadd.f32 %v457_v23, %v411_v22  ;;  %v762_v25 = vpop.f32.mrb[1].mxu0 }
  0xf6   : > { %v460_v27 = vpop.f32.mrb[2].mxu0 }
  0xf7   : > { %vm463_vm2 = vcmp.ge.f32.partialorder %v458_v24, 0.0  ;;  %v470_v28 = vmul.f32 %v468_v26, %v458_v24  ;;  %v763_v29 = vpop.f32.mrb[3].mxu0  ;;  %v586_v27 = vrot.slane %v476_v49, %v559_v9 }
  0xf9   : > { %v471_v30 = vsel %vm463_vm2, %v458_v24, %v470_v28 }
  0xfa   : > { %516 = vrot.lane.b32.xlu0 %v471_v30, %s861_s24  ;;  %490 = vrot.lane.b32.xlu1 %v471_v30, %s862_s25  ;;  %v489_v63 = vmul.f32 %v487_v36, %v471_v30 }
  0xfe   : > { %529 = vrot.lane.b32.xlu0 %v471_v30, %s863_s26  ;;  %503 = vrot.lane.b32.xlu1 %v471_v30, %s864_s27  ;;  %s746_s27 = sshll.u32 %s1048_s16, 3 }
 0x102   : > { %542 = vrot.lane.b32.xlu0 %v471_v30, %s865_s28  ;;  %589 = vperm.xlu1 %822, %v968_v4   ;;  %v534_v4 = vrot.slane %v472_v43, %v533_v62 }
 0x106   : > { %555 = vrot.lane.b32.xlu0 %v471_v30, %s866_s29  ;;  %568 = vrot.lane.b32.xlu1 %v471_v30, %s867_s30  ;;  %s402_s30 = scalar_lea.vmem %s1043_s10, %s746_s27 }
 0x107   : > { %824 = vset.pattern.permute.xlu1 %v852_v5  ;;  %v546_v5 = vsub.s32 3, %v493_v44 }
 0x109   : > { %v547_v12 = vrot.slane %v472_v43, %v546_v5 }
 0x10a   : > { %581 = vrot.lane.b32.xlu1 %v471_v30, %s868_s18  ;;  %597 = vperm.xlu0 %823, %v594_v31  }
 0x10e   : > { %673 = vperm.xlu0 %823, %v669_v32   ;;  %606 = vperm.xlu1 %824, %v603_v35  }
 0x16c   : > { %v491_v52 = vpop.permute.xlu1 %490  ;;  %v517_v53 = vpop.permute.xlu0 %516 }
 0x16d   : > { %v496_v56 = vmul.f32 %v495_v51, %v491_v52  ;;  %v522_v2 = vmul.f32 %v521_v60, %v517_v53 }
 0x16f   : > { %v501_v61 = vmul.f32 %v499_v37, %v496_v56  ;;  %v527_v10 = vmul.f32 %v525_v38, %v522_v2 }
 0x170   : > { %v504_v57 = vpop.permute.xlu1 %503  ;;  %v530_v59 = vpop.permute.xlu0 %529 }
 0x171   : > { %v509_v58 = vmul.f32 %v508_v54, %v504_v57  ;;  %v502_v3 = vadd.f32 %v501_v61, %v489_v63  ;;  %v535_v11 = vmul.f32 %v534_v4, %v530_v59 }
 0x173   : > { %v514_v0 = vmul.f32 %v512_v42, %v509_v58  ;;  %v540_v16 = vmul.f32 %v538_v47, %v535_v11 }
 0x174   : > { %v543_v6 = vpop.permute.xlu0 %542 }
 0x175   : > { %v515_v7 = vadd.f32 %v514_v0, %v502_v3  ;;  %v548_v17 = vmul.f32 %v547_v12, %v543_v6 }
 0x177   : > { %v528_v13 = vadd.f32 %v527_v10, %v515_v7  ;;  %v553_v22 = vmul.f32 %v551_v39, %v548_v17  ;;  %v601_v39 = vld [vmem:[%s1040_s7] sm:$0xf] }
 0x178   : > { %v556_v15 = vpop.permute.xlu0 %555 }
 0x179   : > { %v541_v19 = vadd.f32 %v540_v16, %v528_v13  ;;  %v561_v20 = vmul.f32 %v560_v14, %v556_v15 }
 0x17b   : > { %v554_v24 = vadd.f32 %v553_v22, %v541_v19  ;;  %v566_v25 = vmul.f32 %v564_v40, %v561_v20  ;;  %v666_v40 = vunpack.c.l.bf16 %v1004_v34 }
 0x17d   : > { %v567_v30 = vadd.f32 %v566_v25, %v554_v24  ;;  %v667_v43 = vsel %vm613_vm3, %v666_v40, 0.0 }
 0x181   : > { %v590_v18 = vpop.permute.xlu1 %589 }
 0x185   : > { %v569_v23 = vpop.permute.xlu1 %568 }
 0x186   : > { %v574_v26 = vmul.f32 %v573_v21, %v569_v23 }
 0x188   : > { %v579_v28 = vmul.f32 %v577_v46, %v574_v26 }
 0x189   : > { %v582_v29 = vpop.permute.xlu1 %581  ;;  %v598_v36 = vpop.permute.xlu0 %597 }
 0x18a   : > { %v587_v31 = vmul.f32 %v586_v27, %v582_v29  ;;  %v580_v33 = vadd.f32 %v579_v28, %v567_v30 }
 0x18c   : > { %v592_v32 = vmul.f32 %v590_v18, %v587_v31 }
 0x18d   : > { %v607_v42 = vpop.permute.xlu1 %606  ;;  %v674_v50 = vpop.permute.xlu0 %673 }
 0x18e   : > { %v593_v35 = vadd.f32 %v592_v32, %v580_v33 }
 0x190   : > { %v600_v37 = vadd.f32 %v598_v36, %v593_v35 }
 0x192   : > { %v602_v38 = vpack.c.bf16 %v600_v37, %v600_v37 }
 0x194   : > { %v615_v41 = vsel %vm613_vm3, %v602_v38, 0 }
 0x195   : > { %765 = vmatpush3.bf16.msra.mxu1 %v615_v41 }
 0x198   : > { %767 = vmatmul.mubr.msk.bf16.vlgmr.msra.gmra.mrb[0].mxu1 %vm609_vm4, %v601_v39 }
 0x26b   : > { %v651_v44 = vpop.f32.mrb[0].mxu1 }
 0x26c   : > { %v652_v45 = vadd.f32 %v651_v44, %v607_v42  ;;  %v768_v46 = vpop.f32.mrb[1].mxu1 }
 0x26d   : > { %v654_v47 = vpop.f32.mrb[2].mxu1 }
 0x26e   : > { %v668_v48 = vadd.f32 %v667_v43, %v652_v45  ;;  %v769_v49 = vpop.f32.mrb[3].mxu1 }
 0x270   : > { %vm670_vm5 = vcmp.ge.f32.partialorder %v668_v48, 0.0  ;;  %v676_v51 = vmul.f32 %v674_v50, %v668_v48 }
 0x272   : > { %v677_v52 = vsel %vm670_vm5, %v668_v48, %v676_v51 }
 0x273   : > { %678 = vst [vmem:[%s402_s30] sm:$0xff] %v677_v52 }
 0x274 PF: > { %p17_p9 = scmp.ge.s32.totalorder %s941_s17, 4   ;;  %s1044_s13 = smov %s844_s14 }
 0x275   : > { %s1045_s14 = smov %s950_s20  ;;  %s1046_s15 = smov %s941_s17 }
 0x276   :  { %19 = sbr.rel (!%p17_p9) target bundleno = 2 (0x2), region = 136 }

</bundles_post_ra>
